<compile_context>
chip_gen: v7x
topology: tpu7x:2x2x1
jax: 0.10.0
libtpu: 0.0.40
codegen_flags: <defaults>
</compile_context>

<pallas_src>
import functools

import jax
import jax.numpy as jnp
from jax.experimental import pallas as pl


def _attention_kernel(x_ref, wqkv_ref, wproj_ref, bproj_ref, o_ref,
                      *, batch, seq, num_heads):
    # x_ref:     (B*N, C)   whole flattened batch (single invocation)
    # wqkv_ref:  (C, 3*C)   qkv weight, (in, out) layout, q-columns pre-scaled
    # wproj_ref: (C, C)     proj weight, (in, out) layout
    # bproj_ref: (1, C)     proj bias
    # o_ref:     (B*N, C)
    B, N, H = batch, seq, num_heads
    BN, C = x_ref.shape
    hd = C // H

    # ---- fused qkv projection: one (B*N, C) @ (C, 3C) matmul ---------------
    x = x_ref[...]
    qkv = jnp.dot(x, wqkv_ref[...],
                  preferred_element_type=jnp.float32)            # (BN, 3C)

    # (BN, 3C) -> (B, N, 3C): splits the sublane dim at a multiple of 8.
    qkv = qkv.reshape(B, N, 3 * C)

    # Column layout matches PyTorch reshape(B, N, 3, H, hd):
    #   [q_h0 .. q_h{H-1} | k_h0 .. | v_h0 ..]
    # Stack every head into one leading batch axis -> (H*B, N, hd), so the
    # whole attention is two batched dot_generals.
    def stack_heads(base):
        return jnp.concatenate(
            [qkv[:, :, base + h * hd: base + (h + 1) * hd] for h in range(H)],
            axis=0)                                              # (H*B, N, hd)

    q = stack_heads(0)          # already scaled by head_dim**-0.5 (wrapper)
    k = stack_heads(C)
    v = stack_heads(2 * C)

    # ---- attention: QK^T contracted on the last axes (no explicit k.T) -----
    s = jnp.einsum('bqd,bkd->bqk', q, k,
                   preferred_element_type=jnp.float32)           # (H*B, N, N)

    # numerically-stable softmax over keys
    s = s - jnp.max(s, axis=-1, keepdims=True)
    p = jnp.exp(s)
    p = p * pl.reciprocal(jnp.sum(p, axis=-1, keepdims=True), approx=True)

    ctx = jnp.einsum('bqk,bkd->bqd', p, v,
                     preferred_element_type=jnp.float32)         # (H*B, N, hd)

    # Undo the head stacking.  PyTorch's transpose(1,2).reshape(B,N,C) is
    # exactly "concatenate heads along the channel axis".
    out = jnp.concatenate([ctx[h * B:(h + 1) * B] for h in range(H)],
                          axis=-1)                               # (B, N, C)
    out = out.reshape(BN, C)

    # ---- output projection (+ bias): one (B*N, C) @ (C, C) matmul ----------
    out = jnp.dot(out, wproj_ref[...],
                  preferred_element_type=jnp.float32) + bproj_ref[...]
    o_ref[...] = out.astype(o_ref.dtype)


def attention_forward(x, w_qkv, w_proj, b_proj, *, num_heads):
    """x: (B, N, C).  w_qkv: (C, 3C), w_proj: (C, C), b_proj: (C,).

    Weights are in (in, out) layout (already transposed vs. torch.nn.Linear's
    (out, in) storage), so the kernel computes y = x @ W + b directly.
    """
    B, N, C = x.shape
    assert C % num_heads == 0, "dim must be divisible by num_heads"
    head_dim = C // num_heads
    scale = head_dim ** (-0.5)

    # Fold the 1/sqrt(head_dim) scale into the q columns of the qkv weight
    # once, outside the kernel (scales C weight columns instead of N*N logits).
    col_scale = jnp.concatenate([jnp.full((C,), scale, w_qkv.dtype),
                                 jnp.ones((2 * C,), w_qkv.dtype)])
    w_qkv_scaled = w_qkv * col_scale[None, :]

    kernel = functools.partial(_attention_kernel,
                               batch=B, seq=N, num_heads=num_heads)

    # Single grid-free invocation: everything fits trivially in VMEM at these
    # sizes, so one step removes all per-step pipeline overhead.
    # TODO(synk): for production ViT shapes (N>=196, C>=768) switch to a
    # "parallel" grid over (batch, query-block) with flash-style key tiling
    # and bf16 matmul operands (f32 accumulation), re-deriving tiles for
    # v7x's 64 MiB VMEM / 2 TensorCores.
    out2d = pl.pallas_call(
        kernel,
        out_shape=jax.ShapeDtypeStruct((B * N, C), x.dtype),
    )(x.reshape(B * N, C), w_qkv_scaled, w_proj, b_proj.reshape(1, C))

    return out2d.reshape(B, N, C)


def attention_reference(x, w_qkv, w_proj, b_proj, *, num_heads):
    """Pure-JAX reference replicating the PyTorch forward pass exactly."""
    B, N, C = x.shape
    head_dim = C // num_heads
    scale = head_dim ** (-0.5)

    qkv = jnp.einsum("bnc,cd->bnd", x, w_qkv)                    # (B, N, 3C)
    qkv = qkv.reshape(B, N, 3, num_heads, head_dim)
    qkv = jnp.transpose(qkv, (2, 0, 3, 1, 4))                    # (3, B, H, N, hd)
    q, k, v = qkv[0], qkv[1], qkv[2]

    attn = jnp.einsum("bhnd,bhmd->bhnm", q, k) * scale
    attn = jax.nn.softmax(attn, axis=-1)
    out = jnp.einsum("bhnm,bhmd->bhnd", attn, v)                 # (B, H, N, hd)
    out = jnp.transpose(out, (0, 2, 1, 3)).reshape(B, N, C)
    out = jnp.einsum("bnc,cd->bnd", out, w_proj) + b_proj
    return out


if __name__ == "__main__":
    # Small shapes consistent with the module: dim=32, num_heads=4.
    B, N, C = 2, 8, 32
    num_heads = 4

    key = jax.random.PRNGKey(0)
    kx, kw1, kw2, kb = jax.random.split(key, 4)

    x = jax.random.normal(kx, (B, N, C), dtype=jnp.float32)
    # Deterministic synthetic parameters, (in, out) layout.
    w_qkv = jax.random.normal(kw1, (C, 3 * C), dtype=jnp.float32) * 0.05
    w_proj = jax.random.normal(kw2, (C, C), dtype=jnp.float32) * 0.05
    b_proj = jax.random.normal(kb, (C,), dtype=jnp.float32) * 0.05

    out = attention_forward(x, w_qkv, w_proj, b_proj, num_heads=num_heads)
    out = jax.block_until_ready(out)

    ref = attention_reference(x, w_qkv, w_proj, b_proj, num_heads=num_heads)
    assert out.shape == (B, N, C)
    # Tolerance slightly loosened vs. 1e-4 because the softmax normalizer uses
    # the approximate EUP reciprocal (per perf review); error is far below this.
    assert jnp.allclose(out, ref, atol=2e-3, rtol=2e-3), "mismatch vs reference"

    print("KERNEL_OK")
</pallas_src>

<mosaic_0001>
module attributes {stable_mosaic.version = 11 : i64} {
  func.func @_attention_kernel(%arg0: memref<16x32xf32, #tpu.memory_space<vmem>>, %arg1: memref<32x96xf32, #tpu.memory_space<vmem>>, %arg2: memref<32x32xf32, #tpu.memory_space<vmem>>, %arg3: memref<1x32xf32, #tpu.memory_space<vmem>>, %arg4: memref<16x32xf32, #tpu.memory_space<vmem>>) attributes {dimension_semantics = [], scalar_prefetch = 0 : i64, scratch_operands = 0 : i64, tpu.core_type = #tpu.core_type<tc>} {
    %c0 = arith.constant 0 : index
    %c0_0 = arith.constant 0 : index
    %0 = vector.load %arg0[%c0, %c0_0] : memref<16x32xf32, #tpu.memory_space<vmem>>, vector<16x32xf32>
    %c0_1 = arith.constant 0 : index
    %c0_2 = arith.constant 0 : index
    %1 = vector.load %arg1[%c0_1, %c0_2] : memref<32x96xf32, #tpu.memory_space<vmem>>, vector<32x96xf32>
    %cst = arith.constant dense<0.000000e+00> : vector<16x96xf32>
    %2 = tpu.matmul %0, %1, %cst {dimension_numbers = #tpu.dot_dimension_numbers<[1], [0], [0], [1], [0, 0, 1, 1], [], []>} : vector<16x32xf32>, vector<32x96xf32>, vector<16x96xf32> -> vector<16x96xf32>
    %3 = vector.shape_cast %2 : vector<16x96xf32> to vector<2x8x96xf32>
    %4 = vector.extract_strided_slice %3 {offsets = [0, 0, 0], sizes = [2, 8, 8], strides = [1, 1, 1]} : vector<2x8x96xf32> to vector<2x8x8xf32>
    %5 = vector.extract_strided_slice %3 {offsets = [0, 0, 8], sizes = [2, 8, 8], strides = [1, 1, 1]} : vector<2x8x96xf32> to vector<2x8x8xf32>
    %6 = vector.extract_strided_slice %3 {offsets = [0, 0, 16], sizes = [2, 8, 8], strides = [1, 1, 1]} : vector<2x8x96xf32> to vector<2x8x8xf32>
    %7 = vector.extract_strided_slice %3 {offsets = [0, 0, 24], sizes = [2, 8, 8], strides = [1, 1, 1]} : vector<2x8x96xf32> to vector<2x8x8xf32>
    %8 = tpu.concatenate %4, %5, %6, %7 in 0 : vector<2x8x8xf32>, vector<2x8x8xf32>, vector<2x8x8xf32>, vector<2x8x8xf32> -> vector<8x8x8xf32>
    %9 = vector.extract_strided_slice %3 {offsets = [0, 0, 32], sizes = [2, 8, 8], strides = [1, 1, 1]} : vector<2x8x96xf32> to vector<2x8x8xf32>
    %10 = vector.extract_strided_slice %3 {offsets = [0, 0, 40], sizes = [2, 8, 8], strides = [1, 1, 1]} : vector<2x8x96xf32> to vector<2x8x8xf32>
    %11 = vector.extract_strided_slice %3 {offsets = [0, 0, 48], sizes = [2, 8, 8], strides = [1, 1, 1]} : vector<2x8x96xf32> to vector<2x8x8xf32>
    %12 = vector.extract_strided_slice %3 {offsets = [0, 0, 56], sizes = [2, 8, 8], strides = [1, 1, 1]} : vector<2x8x96xf32> to vector<2x8x8xf32>
    %13 = tpu.concatenate %9, %10, %11, %12 in 0 : vector<2x8x8xf32>, vector<2x8x8xf32>, vector<2x8x8xf32>, vector<2x8x8xf32> -> vector<8x8x8xf32>
    %14 = vector.extract_strided_slice %3 {offsets = [0, 0, 64], sizes = [2, 8, 8], strides = [1, 1, 1]} : vector<2x8x96xf32> to vector<2x8x8xf32>
    %15 = vector.extract_strided_slice %3 {offsets = [0, 0, 72], sizes = [2, 8, 8], strides = [1, 1, 1]} : vector<2x8x96xf32> to vector<2x8x8xf32>
    %16 = vector.extract_strided_slice %3 {offsets = [0, 0, 80], sizes = [2, 8, 8], strides = [1, 1, 1]} : vector<2x8x96xf32> to vector<2x8x8xf32>
    %17 = vector.extract_strided_slice %3 {offsets = [0, 0, 88], sizes = [2, 8, 8], strides = [1, 1, 1]} : vector<2x8x96xf32> to vector<2x8x8xf32>
    %18 = tpu.concatenate %14, %15, %16, %17 in 0 : vector<2x8x8xf32>, vector<2x8x8xf32>, vector<2x8x8xf32>, vector<2x8x8xf32> -> vector<8x8x8xf32>
    "tpu.trace_start"() <{level = 10 : i32, message = "bqd,bkd->bqk"}> : () -> ()
    %cst_3 = arith.constant dense<0.000000e+00> : vector<8x8x8xf32>
    %19 = tpu.matmul %8, %13, %cst_3 {dimension_numbers = #tpu.dot_dimension_numbers<[2], [2], [1], [1], [0, 0, 0, 1, 1, 1], [0], [0]>} : vector<8x8x8xf32>, vector<8x8x8xf32>, vector<8x8x8xf32> -> vector<8x8x8xf32>
    "tpu.trace_stop"() : () -> ()
    %cst_4 = arith.constant dense<0xFF800000> : vector<8x8xf32>
    %20 = vector.multi_reduction <maximumf>, %19, %cst_4 [2] : vector<8x8x8xf32> to vector<8x8xf32>
    %21 = vector.shape_cast %20 : vector<8x8xf32> to vector<8x8x1xf32>
    %22 = vector.broadcast %21 : vector<8x8x1xf32> to vector<8x8x8xf32>
    %23 = arith.subf %19, %22 : vector<8x8x8xf32>
    %24 = math.exp %23 : vector<8x8x8xf32>
    %cst_5 = arith.constant dense<0.000000e+00> : vector<8x8xf32>
    %25 = vector.multi_reduction <add>, %24, %cst_5 [2] : vector<8x8x8xf32> to vector<8x8xf32>
    %26 = vector.shape_cast %25 : vector<8x8xf32> to vector<8x8x1xf32>
    %27 = tpu.reciprocal %26 {approx = true} : vector<8x8x1xf32> -> vector<8x8x1xf32>
    %28 = vector.broadcast %27 : vector<8x8x1xf32> to vector<8x8x8xf32>
    %29 = arith.mulf %24, %28 : vector<8x8x8xf32>
    "tpu.trace_start"() <{level = 10 : i32, message = "bqk,bkd->bqd"}> : () -> ()
    %cst_6 = arith.constant dense<0.000000e+00> : vector<8x8x8xf32>
    %30 = tpu.matmul %29, %18, %cst_6 {dimension_numbers = #tpu.dot_dimension_numbers<[2], [1], [1], [2], [0, 0, 0, 1, 1, 2], [0], [0]>} : vector<8x8x8xf32>, vector<8x8x8xf32>, vector<8x8x8xf32> -> vector<8x8x8xf32>
    "tpu.trace_stop"() : () -> ()
    %31 = vector.extract_strided_slice %30 {offsets = [0, 0, 0], sizes = [2, 8, 8], strides = [1, 1, 1]} : vector<8x8x8xf32> to vector<2x8x8xf32>
    %32 = vector.extract_strided_slice %30 {offsets = [2, 0, 0], sizes = [2, 8, 8], strides = [1, 1, 1]} : vector<8x8x8xf32> to vector<2x8x8xf32>
    %33 = vector.extract_strided_slice %30 {offsets = [4, 0, 0], sizes = [2, 8, 8], strides = [1, 1, 1]} : vector<8x8x8xf32> to vector<2x8x8xf32>
    %34 = vector.extract_strided_slice %30 {offsets = [6, 0, 0], sizes = [2, 8, 8], strides = [1, 1, 1]} : vector<8x8x8xf32> to vector<2x8x8xf32>
    %35 = tpu.concatenate %31, %32, %33, %34 in 2 : vector<2x8x8xf32>, vector<2x8x8xf32>, vector<2x8x8xf32>, vector<2x8x8xf32> -> vector<2x8x32xf32>
    %36 = vector.shape_cast %35 : vector<2x8x32xf32> to vector<16x32xf32>
    %c0_7 = arith.constant 0 : index
    %c0_8 = arith.constant 0 : index
    %37 = vector.load %arg2[%c0_7, %c0_8] : memref<32x32xf32, #tpu.memory_space<vmem>>, vector<32x32xf32>
    %cst_9 = arith.constant dense<0.000000e+00> : vector<16x32xf32>
    %38 = tpu.matmul %36, %37, %cst_9 {dimension_numbers = #tpu.dot_dimension_numbers<[1], [0], [0], [1], [0, 0, 1, 1], [], []>} : vector<16x32xf32>, vector<32x32xf32>, vector<16x32xf32> -> vector<16x32xf32>
    %c0_10 = arith.constant 0 : index
    %c0_11 = arith.constant 0 : index
    %39 = vector.load %arg3[%c0_10, %c0_11] : memref<1x32xf32, #tpu.memory_space<vmem>>, vector<1x32xf32>
    %40 = vector.broadcast %39 : vector<1x32xf32> to vector<16x32xf32>
    %41 = arith.addf %38, %40 : vector<16x32xf32>
    %c0_12 = arith.constant 0 : index
    %c0_13 = arith.constant 0 : index
    %42 = vector.load %arg4[%c0_12, %c0_13] : memref<16x32xf32, #tpu.memory_space<vmem>>, vector<16x32xf32>
    tpu.vector_store %arg4[%c0_12, %c0_13], %41 {strides = array<i32>} : memref<16x32xf32, #tpu.memory_space<vmem>>, vector<16x32xf32>,
    return
  }
}

</mosaic_0001>

<bundles_post_ra>
// kernel: tpu_custom_call.1
= control target key start
LH: loop header
LB: loop body
LE: loop exit
PB: predicated region body
PF: predicated region fallthrough
CT: control target
= control target key end

     0   :  { %9 = vsyncpa [#allocation3], 0  ;;  %s2216_s0 = inlined_call_operand.hbm [shape: f32[16,32], index: 0, kind: input, shape index: {}]   ;;  %s2217_s1 = inlined_call_operand.hbm [shape: f32[32,96], index: 1, kind: input, shape index: {}]   ;;  %s2218_s2 = inlined_call_operand.hbm [shape: f32[32,32], index: 2, kind: input, shape index: {}]   ;;  %s2219_s3 = inlined_call_operand.vmem [shape: f32[1,32], index: 3, kind: input, shape index: {}]   ;;  %s2220_s4 = inlined_call_operand.hbm [shape: f32[16,32], index: 4, kind: output, shape index: {}]  }
   0x1   :  { %10 = vsyncpa [#allocation6], 0 }
   0x2   :  { %11 = vsyncpa [#allocation4], 0  ;;  %s1942_s15 = smov [#allocation5]   ;;  %s1943_s17 = smov [#allocation2]  }
   0x3   :  { %s29_s16 = sshll.u32 %s1942_s15, 4  ;;  %s17_s18 = sshll.u32 %s1943_s17, 4  ;;  %s30_s16 = int_to_ptr.vmem [resolvable:$true] %s29_s16  ;;  %s1982_s18 = int_to_ptr.vmem [resolvable:$true] %s17_s18 }
   0x4   :  { %s1848_s21 = scalar_lea.hbm %s2217_s1, 512 }
   0x5   :  { %p1849_p0 = scmp.ne.s32.totalorder %s2217_s1, %s1848_s21  ;;  %p1852_p1 = scmp.lt.u32.totalorder %s1848_s21, %s2217_s1 }
   0x7   :  { %p1854_p2 = pnand %p1852_p1, %p1849_p0 }
   0x9   :  { %1857 = shalt.err (!%p1854_p2)
}
   0xa   :  { %s1858_s26 = scalar_lea.vmem %s30_s16, 512  ;;  %p1863_p4 = scmp.lt.s32.totalorder %s30_s16, %s30_s16 }
   0xb   :  { %p1859_p3 = scmp.ne.s32.totalorder %s30_s16, %s1858_s26  ;;  %p1864_p5 = scmp.lt.s32.totalorder %s1858_s26, %s1858_s26 }
   0xd   :  { %p1865_p6 = por %p1864_p5, %p1863_p4 }
   0xf   :  { %p1866_p7 = pnand %p1865_p6, %p1859_p3 }
  0x11   :  { %1869 = shalt.err (!%p1866_p7)
}
  0x12   :  { %s1944_s27 = smov 128   ;;  %s1945_s28 = smov 8  }
  0x13   :  { %35 = dma.hbm_to_vmem [thread:$0]  %s2217_s1, 512, %s30_s16, [#allocation6], %s1944_s27, %s1944_s27, %s1945_s28  }
  0x14   :  { %s1870_s7 = scalar_lea.hbm %s2216_s0, 256 }
  0x15   :  { %p1871_p8 = scmp.ne.s32.totalorder %s2216_s0, %s1870_s7  ;;  %p1874_p9 = scmp.lt.u32.totalorder %s1870_s7, %s2216_s0 }
  0x17   :  { %p1876_p10 = pnand %p1874_p9, %p1871_p8 }
  0x19   :  { %1879 = shalt.err (!%p1876_p10)
}
  0x1a   :  { %s1880_s12 = scalar_lea.vmem %s1982_s18, 256  ;;  %p1885_p12 = scmp.lt.s32.totalorder %s1982_s18, %s1982_s18 }
  0x1b   :  { %p1881_p11 = scmp.ne.s32.totalorder %s1982_s18, %s1880_s12  ;;  %p1886_p13 = scmp.lt.s32.totalorder %s1880_s12, %s1880_s12 }
  0x1d   :  { %p1887_p0 = por %p1886_p13, %p1885_p12 }
  0x1f   :  { %p1888_p1 = pnand %p1887_p0, %p1881_p11 }
  0x21   :  { %1891 = shalt.err (!%p1888_p1)
}
  0x22   :  { %23 = dma.hbm_to_vmem [thread:$0]  %s2216_s0, 256, %s1982_s18, [#allocation3], %s1944_s27, %s1944_s27, %s1945_s28  }
  0x23   :  { %s1946_s14 = smov [#allocation7]   ;;  %s1892_s19 = scalar_lea.hbm %s2218_s2, 512 }
  0x24   :  { %s41_s15 = sshll.u32 %s1946_s14, 4  ;;  %p1893_p2 = scmp.ne.s32.totalorder %s2218_s2, %s1892_s19  ;;  %s42_s15 = int_to_ptr.vmem [resolvable:$true] %s41_s15 }
  0x25   :  { %p1896_p3 = scmp.lt.u32.totalorder %s1892_s19, %s2218_s2 }
  0x27   :  { %p1898_p4 = pnand %p1896_p3, %p1893_p2 }
  0x29   :  { %1901 = shalt.err (!%p1898_p4)
}
  0x2a   :  { %s1902_s24 = scalar_lea.vmem %s42_s15, 512  ;;  %p1907_p6 = scmp.lt.s32.totalorder %s42_s15, %s42_s15 }
  0x2b   :  { %p1903_p5 = scmp.ne.s32.totalorder %s42_s15, %s1902_s24  ;;  %p1908_p7 = scmp.lt.s32.totalorder %s1902_s24, %s1902_s24 }
  0x2d   :  { %p1909_p8 = por %p1908_p7, %p1907_p6 }
  0x2f   :  { %p1910_p9 = pnand %p1909_p8, %p1903_p5 }
  0x31   :  { %1913 = shalt.err (!%p1910_p9)
}
  0x32   :  { %47 = dma.hbm_to_vmem [thread:$0]  %s2218_s2, 512, %s42_s15, [#allocation6], %s1944_s27, %s1944_s27, %s1945_s28  }
  0x33   :  { %1936 = dma.done.wait [#allocation3], 256  }
  0x34   :  { %1937 = vsyncadd [#allocation3], 4294967040 }
  0x35   :  { %1938 = dma.done.wait [#allocation6], 1024  }
  0x36   :  { %1939 = vsyncadd [#allocation6], 4294966272  ;;  %vm65_vm0 = vcmask 261120   ;;  %v61_v0 = vld [vmem:[#allocation5] sm:$0xff]  ;;  %v62_v1 = vld [vmem:[#allocation5 + $0x8] sm:$0xff]  ;;  %v1947_v8 = vmov 0.0  }
  0x37   :  { %v63_v2 = vld [vmem:[#allocation5 + $0x10] sm:$0xff]  ;;  %v1785_v3 = vpack.c.bf16 %v62_v1, %v61_v0  ;;  %v64_v4 = vld [vmem:[#allocation5 + $0x18] sm:$0xff]  ;;  %1694 = vmatprep.subr.mxu1 %v1947_v8  ;;  %s1948_s2 = smov 112   ;;  %s1949_s25 = smov 120   ;;  %vm1950_vm1 = vmmov 0   ;;  %vm163_vm2 = vcmask 64512  }
  0x38   :  { %v59_v5 = vld [vmem:[#allocation2] sm:$0xff]  ;;  %v1789_v6 = vpack.c.bf16 %v64_v4, %v63_v2  ;;  %v60_v7 = vld [vmem:[#allocation2 + $0x8] sm:$0xff]  ;;  %1696 = vmatprep.mubr.msk.f32.mxu1 %vm1950_vm1, %v1947_v8  ;;  %s1951_s26 = smov 104   ;;  %s1952_s29 = smov 96   ;;  %vm1492_vm3 = vcmask 130048   ;;  %vm1495_vm4 = vcmask 195584  }
  0x39   :  { %1691 = vmatprep.mubr.msk.f32.mxu0 %vm65_vm0, %v59_v5  ;;  %1786 = vmatprep.subr.bf16.mxu0 %v1785_v3  ;;  %s1953_s30 = smov 64   ;;  %s1954_s5 = smov 16  }
  0x3a   :  { %1788 = vmatpush3.bf16.msra.mxu0 %v1785_v3  ;;  %s1955_s6 = smov 24   ;;  %s1956_s9 = smov [#allocation8]  }
  0x3b   :  { %1790 = vmatprep.subr.bf16.mxu0 %v1789_v6  ;;  %s1597_s10 = sshll.u32 %s1956_s9, 4  ;;  %s1598_s10 = int_to_ptr.vmem [resolvable:$true] %s1597_s10 }
  0x3c   :  { %s1914_s11 = scalar_lea.vmem %s1598_s10, 256  ;;  %p1919_p11 = scmp.lt.s32.totalorder %s1598_s10, %s1598_s10 }
  0x3d   :  { %p1915_p10 = scmp.ne.s32.totalorder %s1598_s10, %s1914_s11  ;;  %p1920_p12 = scmp.lt.s32.totalorder %s1914_s11, %s1914_s11 }
  0x3e   :  { %1792 = vmatpush3.bf16.msra.mxu0 %v1789_v6 }
  0x3f   :  { %1714 = vmatprep.subr.mxu0 %v1947_v8  ;;  %p1921_p13 = por %p1920_p12, %p1919_p11 }
  0x41   :  { %1692 = vmatmul.mubr.msk.f32.vlgmr.msra.gmra.mrb[0].mxu0 %vm65_vm0, %v60_v7  ;;  %p1922_p0 = pnand %p1921_p13, %p1915_p10 }
  0x42   :  { %1716 = vmatprep.mubr.msk.f32.mxu0 %vm1950_vm1, %v1947_v8 }
 0x114   :  { %v2038_v9 = vpop.f32.mrb[0].mxu0 }
 0x115   :  { %v2040_v10 = vpop.f32.mrb[1].mxu0 }
 0x116   :  { %153 = vrot.lane.b32.xlu1 %v2040_v10, %s1948_s2  ;;  %149 = vrot.lane.b32.xlu0 %v2040_v10, %s1949_s25 }
 0x11a   :  { %155 = vrot.lane.b32.xlu1 %v2038_v9, %s1948_s2  ;;  %151 = vrot.lane.b32.xlu0 %v2038_v9, %s1949_s25 }
 0x11e   :  { %159 = vrot.lane.b32.xlu1 %v2038_v9, %s1951_s26  ;;  %157 = vrot.lane.b32.xlu0 %v2040_v10, %s1951_s26 }
 0x122   :  { %238 = vrot.lane.b32.xlu1 %v2038_v9, %s1952_s29  ;;  %161 = vrot.lane.b32.xlu0 %v2040_v10, %s1952_s29 }
 0x188   :  { %v2054_v11 = vpop.permute.xlu1 %153  ;;  %v2056_v12 = vpop.permute.xlu0 %149 }
 0x189   :  { %314 = vrot.lane.b32.xlu0 %v2056_v12, %s1952_s29 }
 0x18c   :  { %v2059_v13 = vpop.permute.xlu1 %155  ;;  %v2061_v14 = vpop.permute.xlu0 %151 }
 0x18d   :  { %466 = vrot.lane.b32.xlu0 %v2054_v11, %s1952_s29  ;;  %390 = vrot.lane.b32.xlu1 %v2061_v14, %s1952_s29 }
 0x190   :  { %v2065_v15 = vpop.permute.xlu0 %157  ;;  %v2069_v16 = vpop.permute.xlu1 %159 }
 0x191   :  { %542 = vrot.lane.b32.xlu1 %v2059_v13, %s1952_s29  ;;  %618 = vrot.lane.b32.xlu0 %v2065_v15, %s1952_s29 }
 0x194   :  { %v162_v17 = vpop.permute.xlu0 %161  ;;  %v239_v18 = vpop.permute.xlu1 %238 }
 0x195   :  { %694 = vrot.lane.b32.xlu1 %v2069_v16, %s1952_s29  ;;  %1695 = vmatpush3.xpose.msk.msra.mxu1 %vm163_vm2, %v162_v17 }
 0x196   :  { %1699 = vmatprep.subr.mxu1 %v1947_v8 }
 0x198   :  { %1697 = vmatmul.mubr.msk.f32.vlgmr.msra.gmra.mrb[0].mxu1 %vm163_vm2, %v2040_v10 }
 0x199   :  { %1700 = vmatpush3.xpose.msk.msra.mxu1 %vm163_vm2, %v239_v18  ;;  %1701 = vmatprep.mubr.msk.f32.mxu1 %vm1950_vm1, %v1947_v8 }
 0x19a   :  { %1704 = vmatprep.subr.mxu1 %v1947_v8 }
 0x19c   :  { %1702 = vmatmul.mubr.msk.f32.vlgmr.msra.gmra.mrb[2].mxu1 %vm163_vm2, %v2038_v9 }
 0x19d   :  { %1706 = vmatprep.mubr.msk.f32.mxu1 %vm1950_vm1, %v1947_v8 }
 0x1fb   :  { %v315_v19 = vpop.permute.xlu0 %314 }
 0x1fc   :  { %1705 = vmatpush3.xpose.msk.msra.mxu1 %vm163_vm2, %v315_v19 }
 0x1fd   :  { %1709 = vmatprep.subr.mxu1 %v1947_v8 }
 0x1ff   :  { %v391_v20 = vpop.permute.xlu1 %390  ;;  %1707 = vmatmul.mubr.msk.f32.vlgmr.msra.gmra.mrb[4].mxu1 %vm163_vm2, %v2056_v12  ;;  %v467_v21 = vpop.permute.xlu0 %466 }
 0x200   :  { %1710 = vmatpush3.xpose.msk.msra.mxu1 %vm163_vm2, %v391_v20  ;;  %1715 = vmatpush3.xpose.msk.msra.mxu0 %vm163_vm2, %v467_v21 }
 0x201   :  { %1711 = vmatprep.mubr.msk.f32.mxu1 %vm1950_vm1, %v1947_v8  ;;  %1719 = vmatprep.subr.mxu1 %v1947_v8 }
 0x202   :  { %1724 = vmatprep.subr.mxu0 %v1947_v8 }
 0x203   :  { %v543_v22 = vpop.permute.xlu1 %542  ;;  %1712 = vmatmul.mubr.msk.f32.vlgmr.msra.gmra.mrb[6].mxu1 %vm163_vm2, %v2061_v14  ;;  %1717 = vmatmul.mubr.msk.f32.vlgmr.msra.gmra.mrb[2].mxu0 %vm163_vm2, %v2054_v11  ;;  %v619_v23 = vpop.permute.xlu0 %618 }
 0x204   :  { %1720 = vmatpush3.xpose.msk.msra.mxu1 %vm163_vm2, %v543_v22  ;;  %1725 = vmatpush3.xpose.msk.msra.mxu0 %vm163_vm2, %v619_v23 }
 0x205   :  { %1721 = vmatprep.mubr.msk.f32.mxu1 %vm1950_vm1, %v1947_v8  ;;  %1726 = vmatprep.mubr.msk.f32.mxu0 %vm1950_vm1, %v1947_v8 }
 0x206   :  { %1729 = vmatprep.subr.mxu1 %v1947_v8  ;;  %1734 = vmatprep.subr.mxu0 %v1947_v8 }
 0x207   :  { %v695_v24 = vpop.permute.xlu1 %694  ;;  %1722 = vmatmul.mubr.msk.f32.vlgmr.msra.gmra.mrb[8].mxu1 %vm163_vm2, %v2059_v13  ;;  %1727 = vmatmul.mubr.msk.f32.vlgmr.msra.gmra.mrb[4].mxu0 %vm163_vm2, %v2065_v15 }
 0x208   :  { %1730 = vmatpush3.xpose.msk.msra.mxu1 %vm163_vm2, %v695_v24  ;;  %1731 = vmatprep.mubr.msk.f32.mxu1 %vm1950_vm1, %v1947_v8 }
 0x209   :  { %1739 = vmatprep.subr.mxu1 %v1947_v8  ;;  %1736 = vmatprep.mubr.msk.f32.mxu0 %vm1950_vm1, %v1947_v8 }
 0x20b   :  { %1732 = vmatmul.mubr.msk.f32.vlgmr.msra.gmra.mrb[10].mxu1 %vm163_vm2, %v2069_v16 }
 0x20c   :  { %1741 = vmatprep.mubr.msk.f32.mxu1 %vm1950_vm1, %v1947_v8 }
 0x26b   :  { %v234_v25 = vpop.f32.mrb[0].mxu1 }
 0x26c   :  { %v1698_v26 = vpop.f32.mrb[1].mxu1  ;;  %v770_v27 = vsel %vm163_vm2, %v234_v25, -inf }
 0x26d   :  { %771 = vmax.xlane.f32.xlu0 %v770_v27 }
 0x26f   :  { %v310_v28 = vpop.f32.mrb[2].mxu1 }
 0x270   :  { %v1703_v29 = vpop.f32.mrb[3].mxu1  ;;  %v773_v30 = vsel %vm163_vm2, %v310_v28, -inf }
 0x271   :  { %774 = vmax.xlane.f32.xlu1 %v773_v30 }
 0x2d2   :  { %v386_v31 = vpop.f32.mrb[4].mxu1 }
 0x2d3   :  { %v1708_v32 = vpop.f32.mrb[5].mxu1  ;;  %v776_v33 = vsel %vm163_vm2, %v386_v31, -inf }
 0x2d4   :  { %777 = vmax.xlane.f32.xlu0 %v776_v33 }
 0x2d6   :  { %v462_v34 = vpop.f32.mrb[6].mxu1  ;;  %v538_v35 = vpop.f32.mrb[2].mxu0 }
 0x2d7   :  { %v1713_v36 = vpop.f32.mrb[7].mxu1  ;;  %v1718_v37 = vpop.f32.mrb[3].mxu0  ;;  %v779_v38 = vsel %vm163_vm2, %v462_v34, -inf  ;;  %v782_v39 = vsel %vm163_vm2, %v538_v35, -inf }
 0x2d8   :  { %780 = vmax.xlane.f32.xlu0 %v779_v38  ;;  %783 = vmax.xlane.f32.xlu1 %v782_v39 }
 0x2da   :  { %v614_v40 = vpop.f32.mrb[8].mxu1  ;;  %v690_v41 = vpop.f32.mrb[4].mxu0 }
 0x2db   :  { %v1723_v42 = vpop.f32.mrb[9].mxu1  ;;  %v1728_v43 = vpop.f32.mrb[5].mxu0  ;;  %v785_v44 = vsel %vm163_vm2, %v614_v40, -inf  ;;  %v788_v45 = vsel %vm163_vm2, %v690_v41, -inf }
 0x2dc   :  { %786 = vmax.xlane.f32.xlu0 %v785_v44  ;;  %789 = vmax.xlane.f32.xlu1 %v788_v45 }
 0x2de   :  { %v766_v46 = vpop.f32.mrb[10].mxu1 }
 0x2df   :  { %v1733_v47 = vpop.f32.mrb[11].mxu1  ;;  %v791_v48 = vsel %vm163_vm2, %v766_v46, -inf }
 0x2e0   :  { %792 = vmax.xlane.f32.xlu0 %v791_v48 }
 0x2ed   :  { %858 = vrot.lane.b32.xlu1 %v2040_v10, %s1953_s30 }
 0x2f1   :  { %1010 = vrot.lane.b32.xlu1 %v2056_v12, %s1953_s30 }
 0x2f5   :  { %1086 = vrot.lane.b32.xlu1 %v2061_v14, %s1953_s30 }
 0x2f6   :  { %934 = vrot.lane.b32.xlu0 %v2038_v9, %s1953_s30 }
 0x2f9   :  { %1238 = vrot.lane.b32.xlu1 %v2059_v13, %s1953_s30 }
 0x2fa   :  { %1162 = vrot.lane.b32.xlu0 %v2054_v11, %s1953_s30  ;;  %v772_v51 = vpop.xlane.xlu0 %771 }
 0x2fb   :  { %v794_v52 = vsub.f32 %v234_v25, %v772_v51 }
 0x2fd   :  { %v802_v54 = vmul.f32 1.442695, %v794_v52 }
 0x2fe   :  { %v775_v49 = vpop.xlane.xlu1 %774 }
 0x2ff   :  { %v795_v50 = vsub.f32 %v310_v28, %v775_v49 }
 0x301   :  { %v804_v53 = vmul.f32 1.442695, %v795_v50 }
 0x303   :  { %1816 = vpow2.f32 %v804_v53 }
 0x304   :  { %1818 = vpow2.f32 %v802_v54 }
 0x30d   :  { %v2140_v55 = vpop.eup %1816 }
 0x30e   :  { %v821_v56 = vsel %vm163_vm2, %v2140_v55, 0.0  ;;  %v2144_v57 = vpop.eup %1818 }
 0x30f   :  { %v818_v58 = vsel %vm163_vm2, %v2144_v57, 0.0 }
 0x319   :  { %822 = vadd.xlane.f32.xlu0 %v821_v56 }
 0x31d   :  { %819 = vadd.xlane.f32.xlu1 %v818_v58 }
 0x361   :  { %v778_v59 = vpop.xlane.xlu0 %777 }
 0x362   :  { %v796_v60 = vsub.f32 %v386_v31, %v778_v59 }
 0x364   :  { %v806_v61 = vmul.f32 1.442695, %v796_v60 }
 0x365   :  { %v784_v62 = vpop.xlane.xlu1 %783  ;;  %v781_v63 = vpop.xlane.xlu0 %780 }
 0x366   :  { %1820 = vpow2.f32 %v806_v61  ;;  %v798_v0 = vsub.f32 %v538_v35, %v784_v62  ;;  %v797_v1 = vsub.f32 %v462_v34, %v781_v63  ;;  %v1498_v62 = vld [vmem:[#allocation7] sm:$0xff]  ;;  %v1499_v63 = vld [vmem:[#allocation7 + $0x8] sm:$0xff] }
 0x368   :  { %v810_v2 = vmul.f32 1.442695, %v798_v0  ;;  %v808_v3 = vmul.f32 1.442695, %v797_v1  ;;  %v1793_v0 = vpack.c.bf16 %v1499_v63, %v1498_v62  ;;  %v1500_v1 = vld [vmem:[#allocation7 + $0x10] sm:$0xff] }
 0x369   :  { %v790_v4 = vpop.xlane.xlu1 %789  ;;  %v787_v5 = vpop.xlane.xlu0 %786 }
 0x36a   :  { %1822 = vpow2.f32 %v810_v2  ;;  %v800_v6 = vsub.f32 %v690_v41, %v790_v4  ;;  %v799_v7 = vsub.f32 %v614_v40, %v787_v5  ;;  %v1501_v2 = vld [vmem:[#allocation7 + $0x18] sm:$0xff] }
 0x36b   :  { %1824 = vpow2.f32 %v808_v3  ;;  %v1797_v3 = vpack.c.bf16 %v1501_v2, %v1500_v1 }
 0x36c   :  { %v814_v9 = vmul.f32 1.442695, %v800_v6  ;;  %v812_v10 = vmul.f32 1.442695, %v799_v7 }
 0x36d   :  { %v859_v11 = vpop.permute.xlu1 %858  ;;  %v793_v12 = vpop.xlane.xlu0 %792 }
 0x36e   :  { %1826 = vpow2.f32 %v814_v9  ;;  %v801_v13 = vsub.f32 %v766_v46, %v793_v12  ;;  %1735 = vmatpush3.msra.mxu0 %v859_v11 }
 0x36f   :  { %1828 = vpow2.f32 %v812_v10  ;;  %1744 = vmatprep.subr.mxu0 %v1947_v8 }
 0x370   :  { %v1821_v14 = vpop.eup %1820  ;;  %v816_v17 = vmul.f32 1.442695, %v801_v13 }
 0x371   :  { %v935_v18 = vpop.permute.xlu0 %934  ;;  %v824_v19 = vsel %vm163_vm2, %v1821_v14, 0.0  ;;  %v1011_v30 = vpop.permute.xlu1 %1010 }
 0x372   :  { %1830 = vpow2.f32 %v816_v17  ;;  %825 = vadd.xlane.f32.xlu1 %v824_v19  ;;  %1740 = vmatpush3.msra.mxu1 %v935_v18 }
 0x373   :  { %1749 = vmatprep.subr.mxu1 %v1947_v8 }
 0x374   :  { %v1823_v20 = vpop.eup %1822 }
 0x375   :  { %v1825_v21 = vpop.eup %1824  ;;  %v830_v22 = vsel %vm163_vm2, %v1823_v20, 0.0  ;;  %v1087_v31 = vpop.permute.xlu1 %1086 }
 0x376   :  { %831 = vadd.xlane.f32.xlu1 %v830_v22  ;;  %v827_v23 = vsel %vm163_vm2, %v1825_v21, 0.0  ;;  %v1163_v32 = vpop.permute.xlu0 %1162 }
 0x377   :  { %828 = vadd.xlane.f32.xlu0 %v827_v23 }
 0x378   :  { %v1827_v24 = vpop.eup %1826 }
 0x379   :  { %v1829_v25 = vpop.eup %1828  ;;  %v836_v26 = vsel %vm163_vm2, %v1827_v24, 0.0  ;;  %v1239_v33 = vpop.permute.xlu1 %1238 }
 0x37a   :  { %837 = vadd.xlane.f32.xlu1 %v836_v26  ;;  %v833_v27 = vsel %vm163_vm2, %v1829_v25, 0.0 }
 0x37b   :  { %834 = vadd.xlane.f32.xlu0 %v833_v27 }
 0x37c   :  { %v2155_v28 = vpop.eup %1830 }
 0x37d   :  { %v839_v29 = vsel %vm163_vm2, %v2155_v28, 0.0 }
 0x37f   :  { %840 = vadd.xlane.f32.xlu0 %v839_v29 }
 0x38b   :  { %1390 = vrot.lane.b32.xlu1 %v2069_v16, %s1953_s30 }
 0x395   :  { %1314 = vrot.lane.b32.xlu0 %v2065_v15, %s1953_s30 }
 0x3a6   :  { %v823_v34 = vpop.xlane.xlu0 %822 }
 0x3a7   :  { %1832 = vrcp.f32 %v823_v34 }
 0x3aa   :  { %v820_v35 = vpop.xlane.xlu1 %819 }
 0x3ab   :  { %1834 = vrcp.f32 %v820_v35 }
 0x3b1   :  { %v1833_v36 = vpop.eup %1832 }
 0x3b2   :  { %v851_v37 = vmul.f32 %v1833_v36, %v2140_v55 }
 0x3b4   :  { %1742 = vmatmul.mubr.msk.f32.vlgmr.msra.gmra.mrb[12].mxu1 %vm163_vm2, %v851_v37 }
 0x3b5   :  { %v1835_v38 = vpop.eup %1834  ;;  %1750 = vmatpush3.msra.mxu1 %v1087_v31  ;;  %1751 = vmatprep.mubr.msk.f32.mxu1 %vm1950_vm1, %v1947_v8 }
 0x3b6   :  { %v850_v15 = vmul.f32 %v1835_v38, %v2144_v57  ;;  %1759 = vmatprep.subr.mxu1 %v1947_v8 }
 0x3b8   :  { %1737 = vmatmul.mubr.msk.f32.vlgmr.msra.gmra.mrb[6].mxu0 %vm163_vm2, %v850_v15 }
 0x3b9   :  { %1745 = vmatpush3.msra.mxu0 %v1011_v30  ;;  %1746 = vmatprep.mubr.msk.f32.mxu0 %vm1950_vm1, %v1947_v8  ;;  %v1636_v30 = vld [vmem:[%s2219_s3] ss:$0 sm:$0xff] }
 0x3ba   :  { %1754 = vmatprep.subr.mxu0 %v1947_v8 }
 0x3ff   :  { %v826_v16 = vpop.xlane.xlu1 %825 }
 0x400   :  { %1836 = vrcp.f32 %v826_v16 }
 0x403   :  { %v832_v39 = vpop.xlane.xlu1 %831 }
 0x404   :  { %1838 = vrcp.f32 %v832_v39  ;;  %v829_v40 = vpop.xlane.xlu0 %828 }
 0x405   :  { %1840 = vrcp.f32 %v829_v40 }
 0x407   :  { %v838_v41 = vpop.xlane.xlu1 %837 }
 0x408   :  { %1842 = vrcp.f32 %v838_v41  ;;  %v835_v42 = vpop.xlane.xlu0 %834 }
 0x409   :  { %1844 = vrcp.f32 %v835_v42 }
 0x40a   :  { %v1837_v43 = vpop.eup %1836 }
 0x40b   :  { %v852_v44 = vmul.f32 %v1837_v43, %v1821_v14  ;;  %v1391_v55 = vpop.permute.xlu1 %1390 }
 0x40c   :  { %v841_v45 = vpop.xlane.xlu0 %840 }
 0x40d   :  { %1846 = vrcp.f32 %v841_v45  ;;  %1747 = vmatmul.mubr.msk.f32.vlgmr.msra.gmra.mrb[8].mxu0 %vm163_vm2, %v852_v44 }
 0x40e   :  { %v1839_v46 = vpop.eup %1838  ;;  %1755 = vmatpush3.msra.mxu0 %v1163_v32  ;;  %1756 = vmatprep.mubr.msk.f32.mxu0 %vm1950_vm1, %v1947_v8 }
 0x40f   :  { %v1841_v47 = vpop.eup %1840  ;;  %v854_v48 = vmul.f32 %v1839_v46, %v1823_v20  ;;  %1764 = vmatprep.subr.mxu0 %v1947_v8 }
 0x410   :  { %v853_v49 = vmul.f32 %v1841_v47, %v1825_v21  ;;  %v1315_v50 = vpop.permute.xlu0 %1314 }
 0x411   :  { %1757 = vmatmul.mubr.msk.f32.vlgmr.msra.gmra.mrb[10].mxu0 %vm163_vm2, %v854_v48 }
 0x412   :  { %v1843_v51 = vpop.eup %1842  ;;  %1752 = vmatmul.mubr.msk.f32.vlgmr.msra.gmra.mrb[14].mxu1 %vm163_vm2, %v853_v49  ;;  %1765 = vmatpush3.msra.mxu0 %v1315_v50 }
 0x413   :  { %v1845_v52 = vpop.eup %1844  ;;  %v856_v53 = vmul.f32 %v1843_v51, %v1827_v24  ;;  %1760 = vmatpush3.msra.mxu1 %v1239_v33  ;;  %1761 = vmatprep.mubr.msk.f32.mxu1 %vm1950_vm1, %v1947_v8 }
 0x414   :  { %v855_v54 = vmul.f32 %v1845_v52, %v1829_v25  ;;  %1766 = vmatprep.mubr.msk.f32.mxu0 %vm1950_vm1, %v1947_v8  ;;  %1769 = vmatprep.subr.mxu1 %v1947_v8 }
 0x415   :  { %1767 = vmatmul.mubr.msk.f32.vlgmr.msra.gmra.mrb[12].mxu0 %vm163_vm2, %v856_v53  ;;  %1794 = vmatprep.subr.bf16.mxu0 %v1793_v0 }
 0x416   :  { %1762 = vmatmul.mubr.msk.f32.vlgmr.msra.gmra.mrb[16].mxu1 %vm163_vm2, %v855_v54  ;;  %1796 = vmatpush3.bf16.msra.mxu0 %v1793_v0 }
 0x417   :  { %v1847_v56 = vpop.eup %1846  ;;  %1770 = vmatpush3.msra.mxu1 %v1391_v55  ;;  %1771 = vmatprep.mubr.msk.f32.mxu1 %vm1950_vm1, %v1947_v8 }
 0x418   :  { %v857_v57 = vmul.f32 %v1847_v56, %v2155_v28  ;;  %1798 = vmatprep.subr.bf16.mxu0 %v1797_v3 }
 0x41a   :  { %1772 = vmatmul.mubr.msk.f32.vlgmr.msra.gmra.mrb[18].mxu1 %vm163_vm2, %v857_v57  ;;  %1800 = vmatpush3.bf16.msra.mxu0 %v1797_v3 }
 0x487   :  { %v1006_v58 = vpop.f32.mrb[12].mxu1 }
 0x488   :  { %v1743_v59 = vpop.f32.mrb[13].mxu1 }
 0x48b   :  { %v930_v60 = vpop.f32.mrb[6].mxu0 }
 0x48c   :  { %v1738_v61 = vpop.f32.mrb[7].mxu0 }
 0x4e0   :  { %v1082_v4 = vpop.f32.mrb[8].mxu0 }
 0x4e1   :  { %v1748_v8 = vpop.f32.mrb[9].mxu0  ;;  %1468 = vrot.lane.b32.xlu0 %v1082_v4, %s1945_s28 }
 0x4e4   :  { %v1234_v5 = vpop.f32.mrb[10].mxu0 }
 0x4e5   :  { %v1158_v6 = vpop.f32.mrb[14].mxu1  ;;  %1476 = vrot.lane.b32.xlu0 %v1234_v5, %s1954_s5  ;;  %v1758_v7 = vpop.f32.mrb[11].mxu0 }
 0x4e6   :  { %1470 = vrot.lane.b32.xlu1 %v1158_v6, %s1945_s28  ;;  %v1753_v9 = vpop.f32.mrb[15].mxu1 }
 0x4e8   :  { %v1386_v10 = vpop.f32.mrb[12].mxu0 }
 0x4e9   :  { %v1310_v11 = vpop.f32.mrb[16].mxu1  ;;  %1484 = vrot.lane.b32.xlu0 %v1386_v10, %s1955_s6  ;;  %v1768_v12 = vpop.f32.mrb[13].mxu0 }
 0x4ea   :  { %1478 = vrot.lane.b32.xlu1 %v1310_v11, %s1954_s5  ;;  %v1763_v13 = vpop.f32.mrb[17].mxu1 }
 0x4ed   :  { %v1462_v14 = vpop.f32.mrb[18].mxu1 }
 0x4ee   :  { %1486 = vrot.lane.b32.xlu1 %v1462_v14, %s1955_s6  ;;  %v1773_v17 = vpop.f32.mrb[19].mxu1 }
 0x553   :  { %v1469_v18 = vpop.permute.xlu0 %1468 }
 0x554   :  { %v1490_v21 = vsel %vm163_vm2, %v930_v60, %v1469_v18 }
 0x557   :  { %v1477_v19 = vpop.permute.xlu0 %1476 }
 0x558   :  { %v1471_v20 = vpop.permute.xlu1 %1470  ;;  %v1493_v22 = vsel %vm1492_vm3, %v1490_v21, %v1477_v19 }
 0x559   :  { %v1491_v26 = vsel %vm163_vm2, %v1006_v58, %v1471_v20 }
 0x55b   :  { %v1485_v23 = vpop.permute.xlu0 %1484 }
 0x55c   :  { %v1479_v24 = vpop.permute.xlu1 %1478  ;;  %v1496_v25 = vsel %vm1495_vm4, %v1493_v22, %v1485_v23 }
 0x55d   :  { %1782 = vmatprep.mubr.msk.f32.mxu0 %vm65_vm0, %v1496_v25  ;;  %v1494_v27 = vsel %vm1492_vm3, %v1491_v26, %v1479_v24 }
 0x560   :  { %v1487_v28 = vpop.permute.xlu1 %1486 }
 0x561   :  { %v1497_v29 = vsel %vm1495_vm4, %v1494_v27, %v1487_v28 }
 0x562   :  { %1783 = vmatmul.mubr.msk.f32.vlgmr.msra.gmra.mrb[14].mxu0 %vm65_vm0, %v1497_v29 }
 0x635   :  { %v1784_v31 = vpop.f32.mrb[14].mxu0 }
 0x636   :  { %v1587_v32 = vadd.f32 %v1784_v31, %v1636_v30  ;;  %v1581_v33 = vpop.f32.mrb[15].mxu0 }
 0x637   :  { %v1582_v34 = vadd.f32 %v1636_v30, %v1581_v33 }
 0x638   :  { %1591 = vst.msk [vmem:[#allocation8 + $0x8] sm:$0xff] %vm65_vm0, %v1587_v32 }
 0x639   :  { %1590 = vst.msk [vmem:[#allocation8] sm:$0xff] %vm65_vm0, %v1582_v34 }
 0x63a   :  { %1925 = shalt.err (!%p1922_p0)
}
 0x63b   :  { %s1926_s1 = scalar_lea.hbm %s2220_s4, 256 }
 0x63c   :  { %p1927_p1 = scmp.ne.s32.totalorder %s2220_s4, %s1926_s1  ;;  %p1930_p2 = scmp.lt.u32.totalorder %s1926_s1, %s2220_s4 }
 0x63e   :  { %p1932_p3 = pnand %p1930_p2, %p1927_p1 }
 0x640   :  { %1935 = shalt.err (!%p1932_p3)
}
 0x641   :  { %1603 = dma.vmem_to_hbm [thread:$0]  %s1598_s10, 256, %s2220_s4, [#allocation4], %s1944_s27, %s1944_s27, %s1945_s28  }
 0x642   :  { %1940 = dma.done.wait [#allocation4], 256  }
 0x643   :  { %1941 = vsyncadd [#allocation4], 4294967040 }
 0x644   :  { %1607 = vsyncpa [#allocation3], 1 }
 0x645   :  { %1608 = vsyncpa [#allocation6], 1 }
 0x646   :  { %1609 = vsyncpa [#allocation4], 1 }

</bundles_post_ra>
